<compile_context>
chip_gen: v7x
topology: tpu7x:2x2x1
jax: 0.10.0
libtpu: 0.0.40
codegen_flags: <defaults>
</compile_context>

<pallas_src>
import jax
import jax.numpy as jnp
from jax.experimental import pallas as pl
from jax.experimental.pallas import tpu as pltpu

NEG_BIG = -1.0e30  # "effectively -inf" while staying finite (exp underflows to exactly 0)


def _round_up(x, m):
    return (x + m - 1) // m * m


def _vmem_limit(working_set_bytes):
    """VMEM limit >= the working set, capped at ~3/4 of this chip's VMEM."""
    try:
        cap = pltpu.get_tpu_info().vmem_capacity_bytes
    except Exception:
        cap = 64 << 20                      # v7x per-TensorCore VMEM = smallest current gen
    ceiling = (cap * 3) // 4
    limit = max(2 * working_set_bytes, 16 << 20)
    limit = min(limit, ceiling)
    return int(max(limit, working_set_bytes + (1 << 20)))   # never clamp below the need


# --------------------------------------------------------------------------------------
# Kernel 1: softmax statistics over the (padded) vocab axis — computed once, not per tile.
# --------------------------------------------------------------------------------------
def _softmax_stats_kernel(state_ref, obs_ref, bias_ref, m_ref, l_ref):
    @pl.when(pl.program_id(0) == 0)
    def _init():
        m_ref[...] = jnp.full(m_ref.shape, NEG_BIG, jnp.float32)
        l_ref[...] = jnp.zeros(l_ref.shape, jnp.float32)

    # score[s, v] = sum_d state[s, d] * obsT[d, v] + bias[v]        (S, tV) f32
    score = jax.lax.dot_general(
        state_ref[...], obs_ref[...],
        dimension_numbers=(((1,), (0,)), ((), ())),
        preferred_element_type=jnp.float32,
        precision=jax.lax.Precision.HIGHEST,
    ) + bias_ref[...]

    m_prev = m_ref[...]
    m_new = jnp.maximum(m_prev, jnp.max(score, axis=-1, keepdims=True))
    l_ref[...] = (jnp.exp(m_prev - m_new) * l_ref[...]
                  + jnp.sum(jnp.exp(score - m_new), axis=-1, keepdims=True))
    m_ref[...] = m_new


# --------------------------------------------------------------------------------------
# Kernel 2: emission probabilities for the gathered observation columns, tiled over T.
# out[s, t] = exp(state[s] . obs[x_t[t]] + bias[x_t[t]] - m[s]) / l[s]   (lane-dense (S,tT))
# --------------------------------------------------------------------------------------
def _emission_kernel(state_ref, obsg_ref, biasg_ref, m_ref, invl_ref, out_ref):
    score = jax.lax.dot_general(
        state_ref[...], obsg_ref[...],
        dimension_numbers=(((1,), (0,)), ((), ())),
        preferred_element_type=jnp.float32,
        precision=jax.lax.Precision.HIGHEST,
    ) + biasg_ref[...]
    out_ref[...] = jnp.exp(score - m_ref[...]) * invl_ref[...]


# --------------------------------------------------------------------------------------
# One-time parameter preparation (hoisted out of the per-call path).
# --------------------------------------------------------------------------------------
def prepare_emission_params(observation_embeddings, bias):
    """Pad the vocab axis to a multiple of 128 lanes and pre-transpose to (D, Vp).

    Padded columns get zero embeddings and a -1e30 bias -> probability exactly 0; the
    module's pad index (V-1 == Vm1) lands on such a column, reproducing the appended zero
    column for free.
    """
    Vm1, D = observation_embeddings.shape
    Vp = _round_up(Vm1 + 1, 128)
    obs_t = jnp.zeros((D, Vp), observation_embeddings.dtype)
    obs_t = obs_t.at[:, :Vm1].set(observation_embeddings.T)
    bias_p = jnp.full((1, Vp), NEG_BIG, jnp.float32)
    bias_p = bias_p.at[0, :Vm1].set(bias.astype(jnp.float32))
    return obs_t, bias_p


def emission_net_forward(state_embeddings, obs_t_pad, bias_pad, x_t, *,
                         t_tile=2048, v_tile=2048):
    """Pallas equivalent of EmissionNet.forward.

    state_embeddings: (S, D)   float32 / bfloat16
    obs_t_pad:        (D, Vp)  from prepare_emission_params
    bias_pad:         (1, Vp)  from prepare_emission_params
    x_t:              (T,)     int indices in [0, V)  (V-1 == pad id)
    returns:          (T, S)   float32
    """
    S, D = state_embeddings.shape
    Vp = obs_t_pad.shape[1]
    T = x_t.shape[0]
    elt = jnp.dtype(state_embeddings.dtype).itemsize

    # ------------------ Pass 1: softmax stats (m, l), computed once -------------------
    vt_max = _round_up(v_tile, 128)
    if Vp <= vt_max:
        tV = Vp
    elif Vp % vt_max == 0:
        tV = vt_max
    else:
        tV = 128                                  # always divides Vp; rare fallback
    n_v = Vp // tV

    ws1 = (2 * S * D * elt                        # state (double-buffered by default)
           + 2 * (D * tV * elt + tV * 4)          # obs^T / bias vocab tiles
           + 4 * S * tV * 4                       # score / exp intermediates
           + 8 * S * 4)                           # m, l outputs
    m, l = pl.pallas_call(
        _softmax_stats_kernel,
        out_shape=(jax.ShapeDtypeStruct((S, 1), jnp.float32),
                   jax.ShapeDtypeStruct((S, 1), jnp.float32)),
        grid=(n_v,),
        in_specs=[
            pl.BlockSpec((S, D), lambda v: (0, 0)),     # state (resident, a few KB)
            pl.BlockSpec((D, tV), lambda v: (0, v)),    # obs^T vocab tile
            pl.BlockSpec((1, tV), lambda v: (0, v)),    # bias vocab tile
        ],
        out_specs=(pl.BlockSpec((S, 1), lambda v: (0, 0)),
                   pl.BlockSpec((S, 1), lambda v: (0, 0))),
        compiler_params=pltpu.CompilerParams(
            dimension_semantics=("arbitrary",),         # vocab axis is a reduction
            vmem_limit_bytes=_vmem_limit(ws1),
        ),
        cost_estimate=pl.CostEstimate(
            flops=2 * S * D * Vp + 4 * S * Vp,
            transcendentals=S * Vp,
            bytes_accessed=(S * D + D * Vp) * elt + Vp * 4 + 2 * S * 4,
        ),
    )(state_embeddings, obs_t_pad, bias_pad)
    inv_l = 1.0 / l                                     # exact f32, once, (S, 1)

    # ------------- Pass 2: gathered emission probabilities, tiled over T --------------
    # D-wide gather in HBM (plain XLA) replaces the in-kernel (Vp, tT) one-hot matmul.
    tT = min(_round_up(T, 128), _round_up(t_tile, 128))
    Tp = _round_up(T, tT)
    n_t = Tp // tT
    xt_p = jnp.full((Tp,), Vp - 1, jnp.int32).at[:T].set(x_t.astype(jnp.int32))
    obs_g = jnp.take(obs_t_pad, xt_p, axis=1)           # (D, Tp), T on the lane axis
    bias_g = jnp.take(bias_pad[0], xt_p, axis=0).reshape(1, Tp)

    ws2 = (2 * S * D * elt                              # state
           + 2 * (D * tT * elt + tT * 4 + S * tT * 4)   # obs_g / bias_g / out tiles
           + 2 * S * tT * 4                             # score intermediate
           + 16 * S * 4)                                # m, inv_l
    out_st = pl.pallas_call(
        _emission_kernel,
        out_shape=jax.ShapeDtypeStruct((S, Tp), jnp.float32),
        grid=(n_t,),
        in_specs=[
            pl.BlockSpec((S, D), lambda t: (0, 0)),     # state (resident)
            pl.BlockSpec((D, tT), lambda t: (0, t)),    # gathered obs columns
            pl.BlockSpec((1, tT), lambda t: (0, t)),    # gathered bias
            pl.BlockSpec((S, 1), lambda t: (0, 0)),     # row max (resident)
            pl.BlockSpec((S, 1), lambda t: (0, 0)),     # 1 / denom (resident)
        ],
        out_specs=pl.BlockSpec((S, tT), lambda t: (0, t)),
        compiler_params=pltpu.CompilerParams(
            dimension_semantics=("parallel",),          # T tiles independent -> megacore
            vmem_limit_bytes=_vmem_limit(ws2),
        ),
        cost_estimate=pl.CostEstimate(
            flops=2 * S * D * Tp + 3 * S * Tp,
            transcendentals=S * Tp,
            bytes_accessed=(S * D + D * Tp) * elt + Tp * 4 + S * Tp * 4 + 2 * S * 4,
        ),
    )(state_embeddings, obs_g, bias_g, m, inv_l)

    # Module contract is (T, S); the kernel keeps T lane-dense, so one small transpose here.
    return out_st[:, :T].T


def emission_net_apply(state_embeddings, observation_embeddings, bias, x_t, **kw):
    """Convenience wrapper mirroring EmissionNet.forward's argument list."""
    obs_t_pad, bias_pad = prepare_emission_params(observation_embeddings, bias)
    return emission_net_forward(state_embeddings, obs_t_pad, bias_pad, x_t, **kw)


def emission_net_reference(state_embeddings, observation_embeddings, bias, x_t):
    """Plain-JAX reference matching the PyTorch forward exactly (full f32 precision)."""
    S = state_embeddings.shape[0]
    score = jnp.einsum('sd,vd->sv', state_embeddings, observation_embeddings,
                       precision=jax.lax.Precision.HIGHEST) + bias[None, :]
    probs = jax.nn.softmax(score, axis=-1)                                   # (S, V-1)
    mat = jnp.concatenate([probs, jnp.zeros((S, 1), probs.dtype)], axis=-1)  # (S, V)
    return mat[:, x_t].T                                                     # (T, S)


if __name__ == "__main__":
    # Small, module-consistent shapes:
    #   num_state S = 8, embedding dim D = 32, vocab size V = 32 (bias has V-1 = 31),
    #   sequence length T = 8.
    S, D, V, T = 8, 32, 32, 8
    Vm1 = V - 1

    key = jax.random.PRNGKey(0)
    k_state, k_obs, k_bias, k_xt = jax.random.split(key, 4)

    state_emb = jax.random.normal(k_state, (S, D), dtype=jnp.float32)
    obs_emb = jax.random.normal(k_obs, (Vm1, D), dtype=jnp.float32)
    bias = jax.random.normal(k_bias, (Vm1,), dtype=jnp.float32)   # nn.Parameter(randn(V-1))
    # x_t includes the pad index V-1 to exercise the zero-pad column path.
    x_t = jax.random.randint(k_xt, (T,), 0, V, dtype=jnp.int32)
    x_t = x_t.at[-1].set(V - 1)

    out = emission_net_apply(state_emb, obs_emb, bias, x_t)
    out = jax.block_until_ready(out)

    ref = emission_net_reference(state_emb, obs_emb, bias, x_t)
    assert out.shape == (T, S), out.shape
    max_err = float(jnp.max(jnp.abs(out - ref)))
    assert jnp.allclose(out, ref, atol=1e-4, rtol=1e-4), f"mismatch vs reference, max_err={max_err}"

    # TODO(synk): dropout_p is declared in the PyTorch module but unused in forward; omitted.
    print("KERNEL_OK")
</pallas_src>

<mosaic_0001>
module attributes {stable_mosaic.version = 11 : i64} {
  func.func @_softmax_stats_kernel(%arg0: i32, %arg1: memref<8x32xf32, #tpu.memory_space<vmem>>, %arg2: memref<32x128xf32, #tpu.memory_space<vmem>>, %arg3: memref<1x128xf32, #tpu.memory_space<vmem>>, %arg4: memref<8x1xf32, #tpu.memory_space<vmem>>, %arg5: memref<8x1xf32, #tpu.memory_space<vmem>>) attributes {dimension_semantics = [#tpu.dimension_semantics<arbitrary>], iteration_bounds = array<i64: 1>, scalar_prefetch = 0 : i64, scratch_operands = 0 : i64, tpu.core_type = #tpu.core_type<tc>, window_params = [{pipeline_mode = #tpu.pipeline_mode<synchronous>, transform_indices = @transform_0, window_bounds = array<i64: 8, 32>}, {transform_indices = @transform_1, window_bounds = array<i64: 32, 128>}, {transform_indices = @transform_2, window_bounds = array<i64: 1, 128>}, {pipeline_mode = #tpu.pipeline_mode<synchronous>, transform_indices = @transform_3, window_bounds = array<i64: 8, 1>}, {pipeline_mode = #tpu.pipeline_mode<synchronous>, transform_indices = @transform_4, window_bounds = array<i64: 8, 1>}]} {
    %c0_i32 = arith.constant 0 : i32
    %0 = arith.cmpi eq, %arg0, %c0_i32 : i32
    %1 = arith.extui %0 : i1 to i32
    %c0_i32_0 = arith.constant 0 : i32
    %2 = arith.cmpi ne, %1, %c0_i32_0 : i32
    scf.if %2 {
      %cst_16 = arith.constant -1.000000e+30 : f32
      %25 = vector.broadcast %cst_16 : f32 to vector<8x1xf32>
      %c0_17 = arith.constant 0 : index
      %c0_18 = arith.constant 0 : index
      %26 = vector.load %arg4[%c0_17, %c0_18] : memref<8x1xf32, #tpu.memory_space<vmem>>, vector<8x1xf32>
      tpu.vector_store %arg4[%c0_17, %c0_18], %25 {strides = array<i32>} : memref<8x1xf32, #tpu.memory_space<vmem>>, vector<8x1xf32>,
      %cst_19 = arith.constant 0.000000e+00 : f32
      %27 = vector.broadcast %cst_19 : f32 to vector<8x1xf32>
      %c0_20 = arith.constant 0 : index
      %c0_21 = arith.constant 0 : index
      %28 = vector.load %arg5[%c0_20, %c0_21] : memref<8x1xf32, #tpu.memory_space<vmem>>, vector<8x1xf32>
      tpu.vector_store %arg5[%c0_20, %c0_21], %27 {strides = array<i32>} : memref<8x1xf32, #tpu.memory_space<vmem>>, vector<8x1xf32>,
    } else {
    }
    %c0 = arith.constant 0 : index
    %c0_1 = arith.constant 0 : index
    %3 = vector.load %arg1[%c0, %c0_1] : memref<8x32xf32, #tpu.memory_space<vmem>>, vector<8x32xf32>
    %c0_2 = arith.constant 0 : index
    %c0_3 = arith.constant 0 : index
    %4 = vector.load %arg2[%c0_2, %c0_3] : memref<32x128xf32, #tpu.memory_space<vmem>>, vector<32x128xf32>
    %cst = arith.constant dense<0.000000e+00> : vector<8x128xf32>
    %5 = tpu.matmul %3, %4, %cst {dimension_numbers = #tpu.dot_dimension_numbers<[1], [0], [0], [1], [0, 0, 1, 1], [], []>, precision = #tpu.contract_precision<fp32>} : vector<8x32xf32>, vector<32x128xf32>, vector<8x128xf32> -> vector<8x128xf32>
    %c0_4 = arith.constant 0 : index
    %c0_5 = arith.constant 0 : index
    %6 = vector.load %arg3[%c0_4, %c0_5] : memref<1x128xf32, #tpu.memory_space<vmem>>, vector<1x128xf32>
    %7 = vector.broadcast %6 : vector<1x128xf32> to vector<8x128xf32>
    %8 = arith.addf %5, %7 : vector<8x128xf32>
    %c0_6 = arith.constant 0 : index
    %c0_7 = arith.constant 0 : index
    %9 = vector.load %arg4[%c0_6, %c0_7] : memref<8x1xf32, #tpu.memory_space<vmem>>, vector<8x1xf32>
    %cst_8 = arith.constant dense<0xFF800000> : vector<8xf32>
    %10 = vector.multi_reduction <maximumf>, %8, %cst_8 [1] : vector<8x128xf32> to vector<8xf32>
    %11 = vector.shape_cast %10 : vector<8xf32> to vector<8x1xf32>
    %12 = arith.maximumf %9, %11 : vector<8x1xf32>
    %13 = arith.subf %9, %12 : vector<8x1xf32>
    %14 = math.exp %13 : vector<8x1xf32>
    %c0_9 = arith.constant 0 : index
    %c0_10 = arith.constant 0 : index
    %15 = vector.load %arg5[%c0_9, %c0_10] : memref<8x1xf32, #tpu.memory_space<vmem>>, vector<8x1xf32>
    %16 = arith.mulf %14, %15 : vector<8x1xf32>
    %17 = vector.broadcast %12 : vector<8x1xf32> to vector<8x128xf32>
    %18 = arith.subf %8, %17 : vector<8x128xf32>
    %19 = math.exp %18 : vector<8x128xf32>
    %cst_11 = arith.constant dense<0.000000e+00> : vector<8xf32>
    %20 = vector.multi_reduction <add>, %19, %cst_11 [1] : vector<8x128xf32> to vector<8xf32>
    %21 = vector.shape_cast %20 : vector<8xf32> to vector<8x1xf32>
    %22 = arith.addf %16, %21 : vector<8x1xf32>
    %c0_12 = arith.constant 0 : index
    %c0_13 = arith.constant 0 : index
    %23 = vector.load %arg5[%c0_12, %c0_13] : memref<8x1xf32, #tpu.memory_space<vmem>>, vector<8x1xf32>
    tpu.vector_store %arg5[%c0_12, %c0_13], %22 {strides = array<i32>} : memref<8x1xf32, #tpu.memory_space<vmem>>, vector<8x1xf32>,
    %c0_14 = arith.constant 0 : index
    %c0_15 = arith.constant 0 : index
    %24 = vector.load %arg4[%c0_14, %c0_15] : memref<8x1xf32, #tpu.memory_space<vmem>>, vector<8x1xf32>
    tpu.vector_store %arg4[%c0_14, %c0_15], %12 {strides = array<i32>} : memref<8x1xf32, #tpu.memory_space<vmem>>, vector<8x1xf32>,
    return
  }
  func.func @transform_0(%arg0: i32) -> (i32, i32) {
    %c0_i32 = arith.constant 0 : i32
    %c0_i32_0 = arith.constant 0 : i32
    %c0_i32_1 = arith.constant 0 : i32
    return %c0_i32, %c0_i32_0 : i32, i32
  }
  func.func @transform_1(%arg0: i32) -> (i32, i32) {
    %c0_i32 = arith.constant 0 : i32
    %c0_i32_0 = arith.constant 0 : i32
    return %c0_i32, %arg0 : i32, i32
  }
  func.func @transform_2(%arg0: i32) -> (i32, i32) {
    %c0_i32 = arith.constant 0 : i32
    %c0_i32_0 = arith.constant 0 : i32
    return %c0_i32, %arg0 : i32, i32
  }
  func.func @transform_3(%arg0: i32) -> (i32, i32) {
    %c0_i32 = arith.constant 0 : i32
    %c0_i32_0 = arith.constant 0 : i32
    %c0_i32_1 = arith.constant 0 : i32
    return %c0_i32, %c0_i32_0 : i32, i32
  }
  func.func @transform_4(%arg0: i32) -> (i32, i32) {
    %c0_i32 = arith.constant 0 : i32
    %c0_i32_0 = arith.constant 0 : i32
    %c0_i32_1 = arith.constant 0 : i32
    return %c0_i32, %c0_i32_0 : i32, i32
  }
}

</mosaic_0001>

<bundles_post_ra>
// kernel: tpu_custom_call.1
= control target key start
LH: loop header
LB: loop body
LE: loop exit
PB: predicated region body
PF: predicated region fallthrough
CT: control target
= control target key end

     0   :  { %10 = vsyncpa [#allocation3], 0  ;;  %s903_s0 = inlined_call_operand.hbm [shape: f32[8,32], index: 0, kind: input, shape index: {}]   ;;  %s904_s1 = inlined_call_operand.hbm [shape: f32[32,128], index: 1, kind: input, shape index: {}]   ;;  %s905_s2 = inlined_call_operand.vmem [shape: f32[1,128], index: 2, kind: input, shape index: {}]   ;;  %s906_s3 = inlined_call_operand.vmem [shape: f32[8,1], index: 3, kind: output, shape index: {0}]   ;;  %s907_s4 = inlined_call_operand.vmem [shape: f32[8,1], index: 4, kind: output, shape index: {1}]  }
   0x1   :  { %11 = vsyncpa [#allocation5], 0  ;;  %s788_s15 = smov [#allocation2]   ;;  %s789_s17 = smov [#allocation4]  }
   0x2   :  { %s18_s16 = sshll.u32 %s788_s15, 4  ;;  %s27_s18 = sshll.u32 %s789_s17, 4  ;;  %s19_s16 = int_to_ptr.vmem [resolvable:$true] %s18_s16  ;;  %s822_s18 = int_to_ptr.vmem [resolvable:$true] %s27_s18 }
   0x3   :  { %s740_s21 = scalar_lea.hbm %s903_s0, 128 }
   0x4   :  { %p741_p0 = scmp.ne.s32.totalorder %s903_s0, %s740_s21  ;;  %p744_p1 = scmp.lt.u32.totalorder %s740_s21, %s903_s0 }
   0x6   :  { %p746_p2 = pnand %p744_p1, %p741_p0 }
   0x8   :  { %749 = shalt.err (!%p746_p2)
}
   0x9   :  { %s750_s26 = scalar_lea.vmem %s19_s16, 128  ;;  %p755_p4 = scmp.lt.s32.totalorder %s19_s16, %s19_s16 }
   0xa   :  { %p751_p3 = scmp.ne.s32.totalorder %s19_s16, %s750_s26  ;;  %p756_p5 = scmp.lt.s32.totalorder %s750_s26, %s750_s26 }
   0xc   :  { %p757_p6 = por %p756_p5, %p755_p4 }
   0xe   :  { %p758_p7 = pnand %p757_p6, %p751_p3 }
  0x10   :  { %761 = shalt.err (!%p758_p7)
}
  0x11   :  { %21 = dma.hbm_to_vmem [thread:$0]  %s903_s0, 128, %s19_s16, [#allocation3]  }
  0x12   :  { %s762_s5 = scalar_lea.hbm %s904_s1, 512 }
  0x13   :  { %p763_p8 = scmp.ne.s32.totalorder %s904_s1, %s762_s5  ;;  %p766_p9 = scmp.lt.u32.totalorder %s762_s5, %s904_s1 }
  0x15   :  { %p768_p10 = pnand %p766_p9, %p763_p8 }
  0x17   :  { %771 = shalt.err (!%p768_p10)
}
  0x18   :  { %s772_s10 = scalar_lea.vmem %s822_s18, 512  ;;  %p777_p12 = scmp.lt.s32.totalorder %s822_s18, %s822_s18 }
  0x19   :  { %p773_p11 = scmp.ne.s32.totalorder %s822_s18, %s772_s10  ;;  %p778_p13 = scmp.lt.s32.totalorder %s772_s10, %s772_s10 }
  0x1b   :  { %p779_p0 = por %p778_p13, %p777_p12 }
  0x1d   :  { %p780_p1 = pnand %p779_p0, %p773_p11 }
  0x1f   :  { %783 = shalt.err (!%p780_p1)
}
  0x20   :  { %s790_s0 = smov 128   ;;  %s791_s11 = smov 8  }
  0x21   :  { %33 = dma.hbm_to_vmem [thread:$0]  %s904_s1, 512, %s822_s18, [#allocation5], %s790_s0, %s790_s0, %s791_s11  }
  0x22   :  { %784 = dma.done.wait [#allocation3], 128  }
  0x23   :  { %785 = vsyncadd [#allocation3], 4294967168 }
  0x24   :  { %786 = dma.done.wait [#allocation5], 512  }
  0x25   :  { %787 = vsyncadd [#allocation5], 4294966784  ;;  %v792_v0 = vmov 0.0|0.0   ;;  %vm793_vm0 = vmmov 0   ;;  %v794_v1 = vmov 0.0   ;;  %vm61_vm1 = vcmask 261120  }
  0x26   :  { %680 = vmatprep.subr.bf16.mxu1 %v792_v0  ;;  %698 = vmatprep.subr.bf16.mxu0 %v792_v0  ;;  %v50_v2 = vld [vmem:[#allocation4] sm:$0xff]  ;;  %v51_v3 = vld [vmem:[#allocation4 + $0x8] sm:$0xff]  ;;  %v52_v4 = vld [vmem:[#allocation4 + $0x10] sm:$0xff]  ;;  %vm46_vm2 = vcmask 7168   ;;  %v795_v41 = vmov -1e+30  }
  0x27   :  { %622 = vmatprep.mubr.msk.f32.mxu1 %vm793_vm0, %v794_v1  ;;  %655 = vmatprep.mubr.msk.f32.mxu0 %vm793_vm0, %v794_v1  ;;  %v66_v5 = vand.u32 4294901760, %v50_v2  ;;  %v69_v6 = vand.u32 4294901760, %v51_v3  ;;  %v53_v7 = vld [vmem:[#allocation4 + $0x18] sm:$0xff]  ;;  %v72_v8 = vand.u32 4294901760, %v52_v4  ;;  %47 = vst.msk [vmem:[%s906_s3] sm:$0xff] %vm46_vm2, %v795_v41  ;;  %48 = vst.msk [vmem:[%s907_s4] sm:$0xff] %vm46_vm2, %v794_v1 }
  0x28   :  { %v49_v9 = vld [vmem:[#allocation2] sm:$0xff]  ;;  %v75_v10 = vand.u32 4294901760, %v53_v7  ;;  %v583_v42 = vld [vmem:[%s905_s2] ss:$0 sm:$0xff]  ;;  %v796_v49 = vmov 0  }
  0x29   :  { %v63_v11 = vsel %vm61_vm1, %v49_v9, 0  ;;  %v681_v12 = vpack.c.bf16 %v69_v6, %v66_v5  ;;  %v146_v13 = vsub.f32 %v50_v2, %v66_v5  ;;  %v153_v14 = vsub.f32 %v51_v3, %v69_v6  ;;  %735 = vset.pattern.permute.xlu0 %v796_v49 }
  0x2a   :  { %v160_v15 = vsub.f32 %v52_v4, %v72_v8  ;;  %v167_v16 = vsub.f32 %v53_v7, %v75_v10  ;;  %v134_v17 = vand.u32 4294901760, %v63_v11  ;;  %v684_v18 = vpack.c.bf16 %v75_v10, %v72_v8 }
  0x2b   :  { %682 = vmatpush3.bf16.msra.mxu1 %v681_v12  ;;  %700 = vmatpush3.bf16.msra.mxu0 %v681_v12  ;;  %v147_v19 = vand.u32 4294901760, %v146_v13  ;;  %v154_v20 = vand.u32 4294901760, %v153_v14  ;;  %v693_v39 = vpack.c.bf16 %v153_v14, %v146_v13 }
  0x2c   :  { %v161_v21 = vand.u32 4294901760, %v160_v15  ;;  %683 = vmatprep.subr.bf16.mxu1 %v792_v0  ;;  %701 = vmatprep.subr.bf16.mxu0 %v792_v0  ;;  %v135_v22 = vsub.f32 %v63_v11, %v134_v17  ;;  %v168_v23 = vand.u32 4294901760, %v167_v16  ;;  %v696_v40 = vpack.c.bf16 %v167_v16, %v160_v15 }
  0x2d   :  { %v148_v24 = vsub.f32 %v146_v13, %v147_v19  ;;  %v155_v25 = vsub.f32 %v153_v14, %v154_v20  ;;  %v705_v31 = vpack.c.bf16 %v154_v20, %v147_v19 }
  0x2e   :  { %v162_v26 = vsub.f32 %v160_v15, %v161_v21  ;;  %v136_v27 = vand.u32 4294901760, %v135_v22  ;;  %v169_v28 = vsub.f32 %v167_v16, %v168_v23  ;;  %v708_v37 = vpack.c.bf16 %v168_v23, %v161_v21  ;;  %v550_v50 = vld [vmem:[%s906_s3] sm:$0xff] }
  0x2f   :  { %685 = vmatpush3.bf16.msra.mxu1 %v684_v18  ;;  %703 = vmatpush3.bf16.msra.mxu0 %v684_v18  ;;  %v149_v29 = vand.u32 4294901760, %v148_v24  ;;  %v156_v30 = vand.u32 4294901760, %v155_v25  ;;  %v557_v60 = vld [vmem:[%s907_s4] sm:$0xff] }
  0x30   :  { %v137_v32 = vsub.f32 %v135_v22, %v136_v27  ;;  %686 = vmatprep.subr.bf16.mxu1 %v792_v0  ;;  %704 = vmatprep.subr.bf16.mxu0 %v792_v0  ;;  %v163_v34 = vand.u32 4294901760, %v162_v26  ;;  %v170_v35 = vand.u32 4294901760, %v169_v28 }
  0x31   :  { %v687_v33 = vpack.c.bf16 %v156_v30, %v149_v29 }
  0x32   :  { %v138_v36 = vand.u32 4294901760, %v137_v32  ;;  %656 = vmatmul.mubr.f32.vlgmr.msra.gmra.mrb[0].mxu0 %v136_v27  ;;  %v690_v38 = vpack.c.bf16 %v170_v35, %v163_v34 }
  0x33   :  { %706 = vmatpush3.bf16.msra.mxu0 %v705_v31  ;;  %666 = vmatprep.mubr.msk.f32.mxu0 %vm793_vm0, %v794_v1 }
  0x34   :  { %623 = vmatmul.mubr.f32.vlgmr.msra.gmra.mrb[0].mxu1 %v138_v36  ;;  %707 = vmatprep.subr.bf16.mxu0 %v792_v0 }
  0x35   :  { %688 = vmatpush3.bf16.msra.mxu1 %v687_v33  ;;  %633 = vmatprep.mubr.msk.f32.mxu1 %vm793_vm0, %v794_v1 }
  0x36   :  { %689 = vmatprep.subr.bf16.mxu1 %v792_v0 }
  0x37   :  { %709 = vmatpush3.bf16.msra.mxu0 %v708_v37 }
  0x38   :  { %710 = vmatprep.subr.bf16.mxu0 %v792_v0 }
  0x39   :  { %691 = vmatpush3.bf16.msra.mxu1 %v690_v38 }
  0x3a   :  { %692 = vmatprep.subr.bf16.mxu1 %v792_v0  ;;  %667 = vmatmul.mubr.f32.vlgmr.msra.gmra.mrb[0].mxu0 %v134_v17 }
  0x3b   :  { %712 = vmatpush3.bf16.msra.mxu0 %v681_v12  ;;  %677 = vmatprep.mubr.msk.f32.mxu0 %vm793_vm0, %v794_v1 }
  0x3c   :  { %634 = vmatmul.mubr.f32.vlgmr.msra.gmra.mrb[0].mxu1 %v134_v17  ;;  %713 = vmatprep.subr.bf16.mxu0 %v792_v0 }
  0x3d   :  { %694 = vmatpush3.bf16.msra.mxu1 %v693_v39  ;;  %644 = vmatprep.mubr.msk.f32.mxu1 %vm793_vm0, %v794_v1 }
  0x3e   :  { %695 = vmatprep.subr.bf16.mxu1 %v792_v0 }
  0x3f   :  { %715 = vmatpush3.bf16.msra.mxu0 %v684_v18 }
  0x41   :  { %697 = vmatpush3.bf16.msra.mxu1 %v696_v40 }
  0x42   :  { %678 = vmatmul.mubr.f32.vlgmr.msra.gmra.mrb[0].mxu0 %v134_v17 }
  0x44   :  { %645 = vmatmul.mubr.f32.vlgmr.msra.gmra.mrb[0].mxu1 %v135_v22 }
 0x115   :  { %v546_v43 = vpop.f32.mrb[0].mxu0 }
 0x116   :  { %v679_v44 = vpop.f32.mrb[1].mxu0 }
 0x117   :  { %v311_v45 = vpop.f32.mrb[0].mxu1 }
 0x118   :  { %v716_v46 = vadd.f32 %v583_v42, %v311_v45  ;;  %v646_v47 = vpop.f32.mrb[1].mxu1 }
 0x11a   :  { %v717_v48 = vadd.f32 %v716_v46, %v546_v43 }
 0x11c   :  { %551 = vmax.xlane.f32.xlu0 %v717_v48 }
 0x1a9   :  { %v552_v51 = vpop.xlane.xlu0 %551 }
 0x1aa   :  { %v553_v52 = vmax.f32 %v550_v50, %v552_v51 }
 0x1ac   :  { %v554_v53 = vsub.f32 %v550_v50, %v553_v52  ;;  %572 = vst.msk [vmem:[%s906_s3] sm:$0xff] %vm46_vm2, %v553_v52  ;;  %561 = vperm.xlu0 %735, %v553_v52  }
 0x1ae   :  { %v555_v58 = vmul.f32 1.442695, %v554_v53 }
 0x22b   :  { %v562_v54 = vpop.permute.xlu0 %561 }
 0x22c   :  { %v564_v55 = vsub.f32 %v717_v48, %v562_v54 }
 0x22e   :  { %v565_v56 = vmul.f32 1.442695, %v564_v55 }
 0x230   :  { %736 = vpow2.f32 %v565_v56 }
 0x231   :  { %738 = vpow2.f32 %v555_v58 }
 0x23a   :  { %v737_v57 = vpop.eup %736 }
 0x23b   :  { %567 = vadd.xlane.f32.xlu1 %v737_v57  ;;  %v739_v59 = vpop.eup %738 }
 0x23c   :  { %v558_v61 = vmul.f32 %v739_v59, %v557_v60 }
 0x2c8   :  { %v568_v62 = vpop.xlane.xlu1 %567 }
 0x2c9   :  { %v569_v63 = vadd.f32 %v568_v62, %v558_v61 }
 0x2cb   :  { %571 = vst.msk [vmem:[%s907_s4] sm:$0xff] %vm46_vm2, %v569_v63 }
 0x2cc   :  { %581 = vsyncpa [#allocation3], 1 }
 0x2cd   :  { %582 = vsyncpa [#allocation5], 1 }

</bundles_post_ra>
